<compile_context>
chip_gen: v6e
topology: v6e:2x2x1
jax: 0.10.0
libtpu: 0.0.40
codegen_flags: <defaults>
</compile_context>

<pallas_src>
import functools

import jax
import jax.numpy as jnp
from jax.experimental import pallas as pl
from jax.experimental.pallas import tpu as pltpu


LANE = 128


def _round_up(x, m):
    return ((x + m - 1) // m) * m


def _deformation_loss_kernel(
    vp_ref, vr_ref, tri_ref, out_ref, acc_vel_ref, acc_div_ref,
    *, alpha, d_time, gv, gt, grid_len, inv_n_vel, inv_n_tri,
):
    i = pl.program_id(0)

    @pl.when(i == 0)
    def _init():
        acc_vel_ref[...] = jnp.zeros_like(acc_vel_ref)
        acc_div_ref[...] = jnp.zeros_like(acc_div_ref)

    # ---- velocity MSE partial sum (lane-dense (trv, 128) tiles) ----
    def _vel_partial():
        d = vr_ref[...] - vp_ref[...]
        acc_vel_ref[...] = acc_vel_ref[...] + jnp.sum(d * d)

    # ---- deformation (jacobian) MSE partial sum ((18, tt) tiles) ----
    def _div_partial():
        dt = jnp.float32(d_time)
        slab = tri_ref[...]                      # (18, tt) lane-dense

        def row(r):                              # (1, tt) row of the slab
            return slab[r:r + 1, :]

        x0a, y0a = row(0), row(1)
        x0b, y0b = row(2), row(3)
        x0c, y0c = row(4), row(5)
        # positions from real velocities
        x1a = x0a + dt * row(6);   y1a = y0a + dt * row(7)
        x1b = x0b + dt * row(8);   y1b = y0b + dt * row(9)
        x1c = x0c + dt * row(10);  y1c = y0c + dt * row(11)
        # positions from predicted velocities
        xpa = x0a + dt * row(12);  ypa = y0a + dt * row(13)
        xpb = x0b + dt * row(14);  ypb = y0b + dt * row(15)
        xpc = x0c + dt * row(16);  ypc = y0c + dt * row(17)

        div_true = (x1b - x1a) * (y1c - y1a) - (x1c - x1a) * (y1b - y1a)
        div_pred = (xpb - xpa) * (ypc - ypa) - (xpc - xpa) * (ypb - ypa)
        dd = div_true - div_pred
        acc_div_ref[...] = acc_div_ref[...] + jnp.sum(dd * dd)

    if gv == grid_len:
        _vel_partial()
    else:
        pl.when(i < gv)(_vel_partial)

    if gt == grid_len:
        _div_partial()
    else:
        pl.when(i < gt)(_div_partial)

    @pl.when(i == grid_len - 1)
    def _finalize():
        vel_loss = acc_vel_ref[...] * jnp.float32(inv_n_vel)
        div_loss = jnp.float32(alpha) * (acc_div_ref[...] * jnp.float32(inv_n_tri))
        out_ref[...] = div_loss + vel_loss


def deformation_loss(v_pred, v_real, init_coords, simplices, *,
                     alpha=1e-15, d_time=3600,
                     vel_tile_rows=512, tri_tile=1024):
    """Pallas equivalent of Deformation_loss.forward, given host-computed simplices."""
    v_pred = jnp.asarray(v_pred, jnp.float32)
    v_real = jnp.asarray(v_real, jnp.float32)
    init_coords = jnp.asarray(init_coords, jnp.float32)
    simplices = jnp.asarray(simplices, jnp.int32)

    n, d = v_pred.shape
    n_vel = n * d
    n_tri = simplices.shape[0]

    vel_tile_rows = _round_up(max(8, vel_tile_rows), 8)
    tri_tile = _round_up(max(LANE, tri_tile), LANE)

    # --- lane-dense velocity layout: flatten (N, D) -> (rows, 128), zero-pad ---
    rows = _round_up(max(1, (n_vel + LANE - 1) // LANE), 8)
    trv = min(vel_tile_rows, rows)
    rows = _round_up(rows, trv)
    gv = rows // trv
    pad_v = rows * LANE - n_vel
    vp_dense = jnp.pad(v_pred.reshape(-1), (0, pad_v)).reshape(rows, LANE)
    vr_dense = jnp.pad(v_real.reshape(-1), (0, pad_v)).reshape(rows, LANE)

    # --- gather per-triangle vertex data into a lane-dense (18, T) slab ---
    # TODO(synk): Delaunay triangulation (scipy, host) and this vertex gather
    # (XLA gather in the wrapper) have no clean Pallas equivalent; only the
    # dense per-triangle math runs in-kernel.
    a, b, c = simplices[:, 0], simplices[:, 1], simplices[:, 2]
    tri = jnp.stack(
        [
            init_coords[a, 0], init_coords[a, 1],
            init_coords[b, 0], init_coords[b, 1],
            init_coords[c, 0], init_coords[c, 1],
            v_real[a, 0], v_real[a, 1],
            v_real[b, 0], v_real[b, 1],
            v_real[c, 0], v_real[c, 1],
            v_pred[a, 0], v_pred[a, 1],
            v_pred[b, 0], v_pred[b, 1],
            v_pred[c, 0], v_pred[c, 1],
        ],
        axis=0,
    )  # (18, T)
    tt = min(tri_tile, _round_up(n_tri, LANE))
    t_pad = _round_up(max(n_tri, 1), tt)
    gt = t_pad // tt
    tri = jnp.pad(tri, ((0, 0), (0, t_pad - n_tri)))  # padded triangles -> 0 diff

    grid_len = max(gv, gt)

    # Clamp-free index maps when the grid lengths match; otherwise clamp so the
    # trailing steps just re-fetch the last tile while compute is pl.when-gated.
    if gv == grid_len:
        vel_idx = lambda i: (i, 0)
    else:
        vel_idx = lambda i: (jnp.minimum(i, gv - 1), 0)
    if gt == grid_len:
        tri_idx = lambda i: (0, i)
    else:
        tri_idx = lambda i: (0, jnp.minimum(i, gt - 1))

    kernel = functools.partial(
        _deformation_loss_kernel,
        alpha=float(alpha), d_time=float(d_time),
        gv=gv, gt=gt, grid_len=grid_len,
        inv_n_vel=1.0 / float(n_vel), inv_n_tri=1.0 / float(n_tri),
    )

    out = pl.pallas_call(
        kernel,
        out_shape=jax.ShapeDtypeStruct((1, 1), jnp.float32),
        grid_spec=pltpu.PrefetchScalarGridSpec(
            num_scalar_prefetch=0,
            grid=(grid_len,),
            in_specs=[
                pl.BlockSpec((trv, LANE), vel_idx),
                pl.BlockSpec((trv, LANE), vel_idx),
                pl.BlockSpec((18, tt), tri_idx),
            ],
            out_specs=pl.BlockSpec((1, 1), lambda i: (0, 0)),
            scratch_shapes=[
                pltpu.VMEM((1, 1), jnp.float32),   # velocity MSE accumulator
                pltpu.VMEM((1, 1), jnp.float32),   # deformation MSE accumulator
            ],
        ),
        compiler_params=pltpu.CompilerParams(
            dimension_semantics=("arbitrary",),
        ),
    )(vp_dense, vr_dense, tri)
    return out[0, 0]


def _reference(v_pred, v_real, init_coords, simplices, *, alpha, d_time):
    """Pure-JAX reference mirroring Deformation_loss.forward (given simplices)."""
    pos_p = v_pred * d_time + init_coords
    pos_r = v_real * d_time + init_coords
    x1, y1 = pos_r[:, 0], pos_r[:, 1]
    xp, yp = pos_p[:, 0], pos_p[:, 1]
    a, b, c = simplices[:, 0], simplices[:, 1], simplices[:, 2]

    def jac(xA, yA, xB, yB, xC, yC):
        return (xB - xA) * (yC - yA) - (xC - xA) * (yB - yA)

    a1 = jac(x1[a], y1[a], x1[b], y1[b], x1[c], y1[c])
    ap = jac(xp[a], yp[a], xp[b], yp[b], xp[c], yp[c])
    div_loss = alpha * jnp.mean((a1 - ap) ** 2)
    vel_loss = jnp.mean((v_real - v_pred) ** 2)
    return div_loss + vel_loss


if __name__ == "__main__":
    key = jax.random.PRNGKey(0)
    k1, k2 = jax.random.split(key)

    # Small structured point set: 16 x 16 grid of initial coordinates (N = 256, D = 2).
    gx, gy = 16, 16
    n_pts = gx * gy
    xs = jnp.arange(gx, dtype=jnp.float32) * 1000.0
    ys = jnp.arange(gy, dtype=jnp.float32) * 1000.0
    xx, yy = jnp.meshgrid(xs, ys, indexing="ij")
    init_coords = jnp.stack([xx.reshape(-1), yy.reshape(-1)], axis=1)  # (256, 2)

    # TODO(synk): the PyTorch module calls scipy.spatial.Delaunay on CPU; here we
    # build the equivalent deterministic triangulation of the regular grid on the
    # host (the triangle indices are preprocessing input to the kernel either way).
    tris = []
    for i in range(gx - 1):
        for j in range(gy - 1):
            p00 = i * gy + j
            p01 = i * gy + (j + 1)
            p10 = (i + 1) * gy + j
            p11 = (i + 1) * gy + (j + 1)
            tris.append([p00, p10, p11])
            tris.append([p00, p11, p01])
    simplices = jnp.asarray(tris, dtype=jnp.int32)  # (450, 3)

    v_pred = jax.random.normal(k1, (n_pts, 2), dtype=jnp.float32)
    v_real = jax.random.normal(k2, (n_pts, 2), dtype=jnp.float32)

    # Default module config (alpha=1e-15, d_time=3600), single-step grid.
    out = deformation_loss(v_pred, v_real, init_coords, simplices,
                           alpha=1e-15, d_time=3600)
    jax.block_until_ready(out)
    ref = _reference(v_pred, v_real, init_coords, simplices,
                     alpha=1e-15, d_time=3600)
    assert jnp.allclose(out, ref, rtol=5e-4, atol=1e-6), (out, ref)

    # Config where the deformation term dominates, with small tiles so the
    # reduction grid has multiple steps (exercises accumulation + clamping).
    out2 = deformation_loss(v_pred, v_real, init_coords, simplices,
                            alpha=1e-9, d_time=3600,
                            vel_tile_rows=8, tri_tile=128)
    jax.block_until_ready(out2)
    ref2 = _reference(v_pred, v_real, init_coords, simplices,
                      alpha=1e-9, d_time=3600)
    assert jnp.allclose(out2, ref2, rtol=5e-4, atol=1e-6), (out2, ref2)

    print("KERNEL_OK")
</pallas_src>

<mosaic_0001>
module attributes {stable_mosaic.version = 11 : i64} {
  func.func @_deformation_loss_kernel(%arg0: i32, %arg1: memref<8x128xf32, #tpu.memory_space<vmem>>, %arg2: memref<8x128xf32, #tpu.memory_space<vmem>>, %arg3: memref<18x512xf32, #tpu.memory_space<vmem>>, %arg4: memref<1x1xf32, #tpu.memory_space<vmem>>, %arg5: memref<1x1xf32, #tpu.memory_space<vmem>>, %arg6: memref<1x1xf32, #tpu.memory_space<vmem>>) attributes {dimension_semantics = [#tpu.dimension_semantics<arbitrary>], iteration_bounds = array<i64: 1>, scalar_prefetch = 0 : i64, scratch_operands = 2 : i64, tpu.core_type = #tpu.core_type<tc>, window_params = [{transform_indices = @transform_0, window_bounds = array<i64: 8, 128>}, {transform_indices = @transform_1, window_bounds = array<i64: 8, 128>}, {transform_indices = @transform_2, window_bounds = array<i64: 18, 512>}, {pipeline_mode = #tpu.pipeline_mode<synchronous>, transform_indices = @transform_3, window_bounds = array<i64: 1, 1>}]} {
    %c0_i32 = arith.constant 0 : i32
    %0 = arith.cmpi eq, %arg0, %c0_i32 : i32
    %1 = arith.extui %0 : i1 to i32
    %c0_i32_0 = arith.constant 0 : i32
    %2 = arith.cmpi ne, %1, %c0_i32_0 : i32
    scf.if %2 {
      %cst_29 = arith.constant 0.000000e+00 : f32
      %97 = vector.broadcast %cst_29 : f32 to vector<1x1xf32>
      %c0_30 = arith.constant 0 : index
      %c0_31 = arith.constant 0 : index
      %98 = vector.load %arg5[%c0_30, %c0_31] : memref<1x1xf32, #tpu.memory_space<vmem>>, vector<1x1xf32>
      tpu.vector_store %arg5[%c0_30, %c0_31], %97 {strides = array<i32>} : memref<1x1xf32, #tpu.memory_space<vmem>>, vector<1x1xf32>,
      %cst_32 = arith.constant 0.000000e+00 : f32
      %99 = vector.broadcast %cst_32 : f32 to vector<1x1xf32>
      %c0_33 = arith.constant 0 : index
      %c0_34 = arith.constant 0 : index
      %100 = vector.load %arg6[%c0_33, %c0_34] : memref<1x1xf32, #tpu.memory_space<vmem>>, vector<1x1xf32>
      tpu.vector_store %arg6[%c0_33, %c0_34], %99 {strides = array<i32>} : memref<1x1xf32, #tpu.memory_space<vmem>>, vector<1x1xf32>,
    } else {
    }
    %c0 = arith.constant 0 : index
    %c0_1 = arith.constant 0 : index
    %3 = vector.load %arg2[%c0, %c0_1] : memref<8x128xf32, #tpu.memory_space<vmem>>, vector<8x128xf32>
    %c0_2 = arith.constant 0 : index
    %c0_3 = arith.constant 0 : index
    %4 = vector.load %arg1[%c0_2, %c0_3] : memref<8x128xf32, #tpu.memory_space<vmem>>, vector<8x128xf32>
    %5 = arith.subf %3, %4 : vector<8x128xf32>
    %c0_4 = arith.constant 0 : index
    %c0_5 = arith.constant 0 : index
    %6 = vector.load %arg5[%c0_4, %c0_5] : memref<1x1xf32, #tpu.memory_space<vmem>>, vector<1x1xf32>
    %7 = arith.mulf %5, %5 : vector<8x128xf32>
    %8 = vector.shape_cast %7 : vector<8x128xf32> to vector<1x8x128xf32>
    %cst = arith.constant dense<0.000000e+00> : vector<1xf32>
    %9 = vector.multi_reduction <add>, %8, %cst [1, 2] : vector<1x8x128xf32> to vector<1xf32>
    %10 = vector.shape_cast %9 : vector<1xf32> to vector<1x1x1xf32>
    %11 = vector.extract %10[0, 0, 0] : f32 from vector<1x1x1xf32>
    %12 = vector.broadcast %11 : f32 to vector<1x1xf32>
    %13 = arith.addf %6, %12 : vector<1x1xf32>
    %c0_6 = arith.constant 0 : index
    %c0_7 = arith.constant 0 : index
    %14 = vector.load %arg5[%c0_6, %c0_7] : memref<1x1xf32, #tpu.memory_space<vmem>>, vector<1x1xf32>
    tpu.vector_store %arg5[%c0_6, %c0_7], %13 {strides = array<i32>} : memref<1x1xf32, #tpu.memory_space<vmem>>, vector<1x1xf32>,
    %c0_8 = arith.constant 0 : index
    %c0_9 = arith.constant 0 : index
    %15 = vector.load %arg3[%c0_8, %c0_9] : memref<18x512xf32, #tpu.memory_space<vmem>>, vector<18x512xf32>
    %16 = vector.extract_strided_slice %15 {offsets = [0, 0], sizes = [1, 512], strides = [1, 1]} : vector<18x512xf32> to vector<1x512xf32>
    %17 = vector.extract_strided_slice %15 {offsets = [1, 0], sizes = [1, 512], strides = [1, 1]} : vector<18x512xf32> to vector<1x512xf32>
    %18 = vector.extract_strided_slice %15 {offsets = [2, 0], sizes = [1, 512], strides = [1, 1]} : vector<18x512xf32> to vector<1x512xf32>
    %19 = vector.extract_strided_slice %15 {offsets = [3, 0], sizes = [1, 512], strides = [1, 1]} : vector<18x512xf32> to vector<1x512xf32>
    %20 = vector.extract_strided_slice %15 {offsets = [4, 0], sizes = [1, 512], strides = [1, 1]} : vector<18x512xf32> to vector<1x512xf32>
    %21 = vector.extract_strided_slice %15 {offsets = [5, 0], sizes = [1, 512], strides = [1, 1]} : vector<18x512xf32> to vector<1x512xf32>
    %22 = vector.extract_strided_slice %15 {offsets = [6, 0], sizes = [1, 512], strides = [1, 1]} : vector<18x512xf32> to vector<1x512xf32>
    %cst_10 = arith.constant 3.600000e+03 : f32
    %23 = vector.broadcast %cst_10 : f32 to vector<1x512xf32>
    %24 = arith.mulf %23, %22 : vector<1x512xf32>
    %25 = arith.addf %16, %24 : vector<1x512xf32>
    %26 = vector.extract_strided_slice %15 {offsets = [7, 0], sizes = [1, 512], strides = [1, 1]} : vector<18x512xf32> to vector<1x512xf32>
    %cst_11 = arith.constant 3.600000e+03 : f32
    %27 = vector.broadcast %cst_11 : f32 to vector<1x512xf32>
    %28 = arith.mulf %27, %26 : vector<1x512xf32>
    %29 = arith.addf %17, %28 : vector<1x512xf32>
    %30 = vector.extract_strided_slice %15 {offsets = [8, 0], sizes = [1, 512], strides = [1, 1]} : vector<18x512xf32> to vector<1x512xf32>
    %cst_12 = arith.constant 3.600000e+03 : f32
    %31 = vector.broadcast %cst_12 : f32 to vector<1x512xf32>
    %32 = arith.mulf %31, %30 : vector<1x512xf32>
    %33 = arith.addf %18, %32 : vector<1x512xf32>
    %34 = vector.extract_strided_slice %15 {offsets = [9, 0], sizes = [1, 512], strides = [1, 1]} : vector<18x512xf32> to vector<1x512xf32>
    %cst_13 = arith.constant 3.600000e+03 : f32
    %35 = vector.broadcast %cst_13 : f32 to vector<1x512xf32>
    %36 = arith.mulf %35, %34 : vector<1x512xf32>
    %37 = arith.addf %19, %36 : vector<1x512xf32>
    %38 = vector.extract_strided_slice %15 {offsets = [10, 0], sizes = [1, 512], strides = [1, 1]} : vector<18x512xf32> to vector<1x512xf32>
    %cst_14 = arith.constant 3.600000e+03 : f32
    %39 = vector.broadcast %cst_14 : f32 to vector<1x512xf32>
    %40 = arith.mulf %39, %38 : vector<1x512xf32>
    %41 = arith.addf %20, %40 : vector<1x512xf32>
    %42 = vector.extract_strided_slice %15 {offsets = [11, 0], sizes = [1, 512], strides = [1, 1]} : vector<18x512xf32> to vector<1x512xf32>
    %cst_15 = arith.constant 3.600000e+03 : f32
    %43 = vector.broadcast %cst_15 : f32 to vector<1x512xf32>
    %44 = arith.mulf %43, %42 : vector<1x512xf32>
    %45 = arith.addf %21, %44 : vector<1x512xf32>
    %46 = vector.extract_strided_slice %15 {offsets = [12, 0], sizes = [1, 512], strides = [1, 1]} : vector<18x512xf32> to vector<1x512xf32>
    %cst_16 = arith.constant 3.600000e+03 : f32
    %47 = vector.broadcast %cst_16 : f32 to vector<1x512xf32>
    %48 = arith.mulf %47, %46 : vector<1x512xf32>
    %49 = arith.addf %16, %48 : vector<1x512xf32>
    %50 = vector.extract_strided_slice %15 {offsets = [13, 0], sizes = [1, 512], strides = [1, 1]} : vector<18x512xf32> to vector<1x512xf32>
    %cst_17 = arith.constant 3.600000e+03 : f32
    %51 = vector.broadcast %cst_17 : f32 to vector<1x512xf32>
    %52 = arith.mulf %51, %50 : vector<1x512xf32>
    %53 = arith.addf %17, %52 : vector<1x512xf32>
    %54 = vector.extract_strided_slice %15 {offsets = [14, 0], sizes = [1, 512], strides = [1, 1]} : vector<18x512xf32> to vector<1x512xf32>
    %cst_18 = arith.constant 3.600000e+03 : f32
    %55 = vector.broadcast %cst_18 : f32 to vector<1x512xf32>
    %56 = arith.mulf %55, %54 : vector<1x512xf32>
    %57 = arith.addf %18, %56 : vector<1x512xf32>
    %58 = vector.extract_strided_slice %15 {offsets = [15, 0], sizes = [1, 512], strides = [1, 1]} : vector<18x512xf32> to vector<1x512xf32>
    %cst_19 = arith.constant 3.600000e+03 : f32
    %59 = vector.broadcast %cst_19 : f32 to vector<1x512xf32>
    %60 = arith.mulf %59, %58 : vector<1x512xf32>
    %61 = arith.addf %19, %60 : vector<1x512xf32>
    %62 = vector.extract_strided_slice %15 {offsets = [16, 0], sizes = [1, 512], strides = [1, 1]} : vector<18x512xf32> to vector<1x512xf32>
    %cst_20 = arith.constant 3.600000e+03 : f32
    %63 = vector.broadcast %cst_20 : f32 to vector<1x512xf32>
    %64 = arith.mulf %63, %62 : vector<1x512xf32>
    %65 = arith.addf %20, %64 : vector<1x512xf32>
    %66 = vector.extract_strided_slice %15 {offsets = [17, 0], sizes = [1, 512], strides = [1, 1]} : vector<18x512xf32> to vector<1x512xf32>
    %cst_21 = arith.constant 3.600000e+03 : f32
    %67 = vector.broadcast %cst_21 : f32 to vector<1x512xf32>
    %68 = arith.mulf %67, %66 : vector<1x512xf32>
    %69 = arith.addf %21, %68 : vector<1x512xf32>
    %70 = arith.subf %33, %25 : vector<1x512xf32>
    %71 = arith.subf %45, %29 : vector<1x512xf32>
    %72 = arith.mulf %70, %71 : vector<1x512xf32>
    %73 = arith.subf %41, %25 : vector<1x512xf32>
    %74 = arith.subf %37, %29 : vector<1x512xf32>
    %75 = arith.mulf %73, %74 : vector<1x512xf32>
    %76 = arith.subf %72, %75 : vector<1x512xf32>
    %77 = arith.subf %57, %49 : vector<1x512xf32>
    %78 = arith.subf %69, %53 : vector<1x512xf32>
    %79 = arith.mulf %77, %78 : vector<1x512xf32>
    %80 = arith.subf %65, %49 : vector<1x512xf32>
    %81 = arith.subf %61, %53 : vector<1x512xf32>
    %82 = arith.mulf %80, %81 : vector<1x512xf32>
    %83 = arith.subf %79, %82 : vector<1x512xf32>
    %84 = arith.subf %76, %83 : vector<1x512xf32>
    %c0_22 = arith.constant 0 : index
    %c0_23 = arith.constant 0 : index
    %85 = vector.load %arg6[%c0_22, %c0_23] : memref<1x1xf32, #tpu.memory_space<vmem>>, vector<1x1xf32>
    %86 = arith.mulf %84, %84 : vector<1x512xf32>
    %87 = vector.shape_cast %86 : vector<1x512xf32> to vector<1x1x512xf32>
    %cst_24 = arith.constant dense<0.000000e+00> : vector<1xf32>
    %88 = vector.multi_reduction <add>, %87, %cst_24 [1, 2] : vector<1x1x512xf32> to vector<1xf32>
    %89 = vector.shape_cast %88 : vector<1xf32> to vector<1x1x1xf32>
    %90 = vector.extract %89[0, 0, 0] : f32 from vector<1x1x1xf32>
    %91 = vector.broadcast %90 : f32 to vector<1x1xf32>
    %92 = arith.addf %85, %91 : vector<1x1xf32>
    %c0_25 = arith.constant 0 : index
    %c0_26 = arith.constant 0 : index
    %93 = vector.load %arg6[%c0_25, %c0_26] : memref<1x1xf32, #tpu.memory_space<vmem>>, vector<1x1xf32>
    tpu.vector_store %arg6[%c0_25, %c0_26], %92 {strides = array<i32>} : memref<1x1xf32, #tpu.memory_space<vmem>>, vector<1x1xf32>,
    %c0_i32_27 = arith.constant 0 : i32
    %94 = arith.cmpi eq, %arg0, %c0_i32_27 : i32
    %95 = arith.extui %94 : i1 to i32
    %c0_i32_28 = arith.constant 0 : i32
    %96 = arith.cmpi ne, %95, %c0_i32_28 : i32
    scf.if %96 {
      %c0_29 = arith.constant 0 : index
      %c0_30 = arith.constant 0 : index
      %97 = vector.load %arg5[%c0_29, %c0_30] : memref<1x1xf32, #tpu.memory_space<vmem>>, vector<1x1xf32>
      %cst_31 = arith.constant 0.001953125 : f32
      %98 = vector.broadcast %cst_31 : f32 to vector<1x1xf32>
      %99 = arith.mulf %97, %98 : vector<1x1xf32>
      %c0_32 = arith.constant 0 : index
      %c0_33 = arith.constant 0 : index
      %100 = vector.load %arg6[%c0_32, %c0_33] : memref<1x1xf32, #tpu.memory_space<vmem>>, vector<1x1xf32>
      %cst_34 = arith.constant 0.00222222228 : f32
      %101 = vector.broadcast %cst_34 : f32 to vector<1x1xf32>
      %102 = arith.mulf %100, %101 : vector<1x1xf32>
      %cst_35 = arith.constant 1.000000e-15 : f32
      %103 = vector.broadcast %cst_35 : f32 to vector<1x1xf32>
      %104 = arith.mulf %103, %102 : vector<1x1xf32>
      %105 = arith.addf %104, %99 : vector<1x1xf32>
      %c0_36 = arith.constant 0 : index
      %c0_37 = arith.constant 0 : index
      %106 = vector.load %arg4[%c0_36, %c0_37] : memref<1x1xf32, #tpu.memory_space<vmem>>, vector<1x1xf32>
      tpu.vector_store %arg4[%c0_36, %c0_37], %105 {strides = array<i32>} : memref<1x1xf32, #tpu.memory_space<vmem>>, vector<1x1xf32>,
    } else {
    }
    return
  }
  func.func @transform_0(%arg0: i32) -> (i32, i32) {
    %c0_i32 = arith.constant 0 : i32
    %c0_i32_0 = arith.constant 0 : i32
    return %arg0, %c0_i32 : i32, i32
  }
  func.func @transform_1(%arg0: i32) -> (i32, i32) {
    %c0_i32 = arith.constant 0 : i32
    %c0_i32_0 = arith.constant 0 : i32
    return %arg0, %c0_i32 : i32, i32
  }
  func.func @transform_2(%arg0: i32) -> (i32, i32) {
    %c0_i32 = arith.constant 0 : i32
    %c0_i32_0 = arith.constant 0 : i32
    return %c0_i32, %arg0 : i32, i32
  }
  func.func @transform_3(%arg0: i32) -> (i32, i32) {
    %c0_i32 = arith.constant 0 : i32
    %c0_i32_0 = arith.constant 0 : i32
    %c0_i32_1 = arith.constant 0 : i32
    return %c0_i32, %c0_i32_0 : i32, i32
  }
}

</mosaic_0001>

<bundles_post_ra>
// kernel: tpu_custom_call.1
= control target key start
LH: loop header
LB: loop body
LE: loop exit
PB: predicated region body
PF: predicated region fallthrough
CT: control target
= control target key end

     0   :  { %8 = vsyncpa [#allocation5], 0  ;;  %s559_s0 = inlined_call_operand.hbm [shape: f32[8,128], index: 0, kind: input, shape index: {}]   ;;  %s560_s1 = inlined_call_operand.hbm [shape: f32[8,128], index: 1, kind: input, shape index: {}]   ;;  %s561_s2 = inlined_call_operand.hbm [shape: f32[18,512], index: 2, kind: input, shape index: {}]   ;;  %s562_s3 = inlined_call_operand.hbm [shape: f32[1,1], index: 3, kind: output, shape index: {}]  }
   0x1   :  { %9 = vsyncpa [#allocation8], 0 }
   0x2   :  { %10 = vsyncpa [#allocation6], 0  ;;  %s477_s12 = smov [#allocation7]   ;;  %s478_s14 = smov [#allocation4]  }
   0x3   :  { %s27_s13 = sshll.u32 %s477_s12, 4  ;;  %s17_s15 = sshll.u32 %s478_s14, 4  ;;  %s28_s13 = int_to_ptr.vmem [resolvable:$true] %s27_s13  ;;  %s18_s15 = int_to_ptr.vmem [resolvable:$true] %s17_s15 }
   0x4   :  { %s399_s16 = scalar_lea.vmem %s28_s13, 128  ;;  %p404_p1 = scmp.lt.s32.totalorder %s28_s13, %s28_s13 }
   0x5   :  { %p400_p0 = scmp.ne.s32.totalorder %s28_s13, %s399_s16  ;;  %p405_p2 = scmp.lt.s32.totalorder %s399_s16, %s399_s16 }
   0x7   :  { %p406_p3 = por %p405_p2, %p404_p1 }
   0x9   :  { %p407_p4 = pnand %p406_p3, %p400_p0 }
   0xb   :  { %410 = shalt.err (!%p407_p4)
}
   0xc   :  { %30 = dma.hbm_to_vmem [thread:$0]  %s560_s1, 128, %s28_s13, [#allocation8]  }
   0xd   :  { %s419_s19 = scalar_lea.vmem %s18_s15, 128  ;;  %p424_p6 = scmp.lt.s32.totalorder %s18_s15, %s18_s15 }
   0xe   :  { %p420_p5 = scmp.ne.s32.totalorder %s18_s15, %s419_s19  ;;  %p425_p7 = scmp.lt.s32.totalorder %s419_s19, %s419_s19 }
  0x10   :  { %p426_p8 = por %p425_p7, %p424_p6 }
  0x12   :  { %p427_p9 = pnand %p426_p8, %p420_p5 }
  0x14   :  { %430 = shalt.err (!%p427_p9)
}
  0x15   :  { %20 = dma.hbm_to_vmem [thread:$0]  %s559_s0, 128, %s18_s15, [#allocation5]  }
  0x16   :  { %s479_s22 = smov [#allocation9]  }
  0x17   :  { %s36_s23 = sshll.u32 %s479_s22, 4  ;;  %s37_s23 = int_to_ptr.vmem [resolvable:$true] %s36_s23 }
  0x18   :  { %s439_s24 = scalar_lea.vmem %s37_s23, 1536  ;;  %p444_p11 = scmp.lt.s32.totalorder %s37_s23, %s37_s23 }
  0x19   :  { %p440_p10 = scmp.ne.s32.totalorder %s37_s23, %s439_s24  ;;  %p445_p12 = scmp.lt.s32.totalorder %s439_s24, %s439_s24 }
  0x1b   :  { %p446_p13 = por %p445_p12, %p444_p11 }
  0x1d   :  { %p447_p0 = pnand %p446_p13, %p440_p10 }
  0x1f   :  { %450 = shalt.err (!%p447_p0)
}
  0x20   :  { %s480_s1 = smov 512   ;;  %s481_s25 = smov 32  }
  0x21   :  { %42 = dma.hbm_to_vmem [thread:$0]  %s561_s2, 1536, %s37_s23, [#allocation8], %s480_s1, %s480_s1, %s481_s25  }
  0x22   :  { %471 = dma.done.wait [#allocation5], 128  }
  0x23   :  { %472 = vsyncadd [#allocation5], 4294967168 }
  0x24   :  { %473 = dma.done.wait [#allocation8], 1664  }
  0x25   :  { %474 = vsyncadd [#allocation8], 4294965632  ;;  %v59_v0 = vld [vmem:[#allocation7] sm:$0xff]  ;;  %v60_v1 = vld [vmem:[#allocation4] sm:$0xff]  ;;  %vm334_vm0 = vcmask 1040384   ;;  %vm56_vm1 = vcmask 0  }
  0x26   :  { %v513_v2 = vld [vmem:[#allocation9] sm:$0xff]  ;;  %v61_v3 = vsub.f32 %v59_v0, %v60_v1  ;;  %v515_v4 = vld [vmem:[#allocation9 + $0x8] sm:$0xff]  ;;  %v517_v5 = vld [vmem:[#allocation9 + $0x10] sm:$0xff]  ;;  %s483_s28 = smov [#allocation10]  }
  0x27   :  { %v519_v6 = vld [vmem:[#allocation9 + $0x18] sm:$0xff]  ;;  %v89_v7 = vmul.f32 3600.0, %v513_v2  ;;  %v81_v8 = vld [vmem:[#allocation9 + $0x20] sm:$0xff]  ;;  %v82_v9 = vld [vmem:[#allocation9 + $0x28] sm:$0xff]  ;;  %v90_v10 = vmul.f32 3600.0, %v515_v4  ;;  %v91_v11 = vmul.f32 3600.0, %v517_v5 }
  0x28   :  { %v92_v12 = vmul.f32 3600.0, %v519_v6  ;;  %v63_v13 = vmul.f32 %v61_v3, %v61_v3  ;;  %v83_v14 = vld [vmem:[#allocation9 + $0x30] sm:$0xff]  ;;  %v84_v15 = vld [vmem:[#allocation9 + $0x38] sm:$0xff]  ;;  %v109_v20 = vmul.f32 3600.0, %v81_v8  ;;  %v110_v21 = vmul.f32 3600.0, %v82_v9  ;;  %s370_s29 = sshll.u32 %s483_s28, 4  ;;  %s371_s29 = int_to_ptr.vmem [resolvable:$true] %s370_s29 }
  0x29   :  { %v97_v16 = vrot.slane %v89_v7, 6  ;;  %v98_v17 = vrot.slane %v90_v10, 6  ;;  %v99_v18 = vrot.slane %v91_v11, 6  ;;  %v111_v22 = vmul.f32 3600.0, %v83_v14  ;;  %v85_v24 = vld [vmem:[#allocation9 + $0x40] sm:$0x3]  ;;  %p456_p2 = scmp.lt.s32.totalorder %s371_s29, %s371_s29 }
  0x2a   :  { %64 = vadd.xlane.f32.xlu0 %v63_v13  ;;  %v100_v19 = vrot.slane %v92_v12, 6  ;;  %v112_v23 = vmul.f32 3600.0, %v84_v15  ;;  %v117_v26 = vrot.slane %v109_v20, 6  ;;  %v118_v27 = vrot.slane %v110_v21, 6  ;;  %v86_v29 = vld [vmem:[#allocation9 + $0x48] sm:$0x3] }
  0x2b   :  { %v105_v25 = vadd.f32 %v97_v16, %v513_v2  ;;  %v129_v28 = vrot.slane %v109_v20, 4  ;;  %v87_v30 = vld [vmem:[#allocation9 + $0x50] sm:$0x3]  ;;  %v106_v31 = vadd.f32 %v98_v17, %v515_v4  ;;  %v107_v32 = vadd.f32 %v99_v18, %v517_v5  ;;  %v88_v35 = vld [vmem:[#allocation9 + $0x58] sm:$0x3]  ;;  %s451_s30 = scalar_lea.vmem %s371_s29, 16 }
  0x2c   :  { %v119_v33 = vrot.slane %v111_v22, 6  ;;  %v120_v34 = vrot.slane %v112_v23, 6  ;;  %v108_v36 = vadd.f32 %v100_v19, %v519_v6  ;;  %v125_v37 = vadd.f32 %v117_v26, %v513_v2  ;;  %p452_p1 = scmp.ne.s32.totalorder %s371_s29, %s451_s30  ;;  %s455_s4 = scalar_lea.vmem %s371_s29, 32 }
  0x2d   :  { %v130_v38 = vrot.slane %v110_v21, 4  ;;  %v131_v39 = vrot.slane %v111_v22, 4  ;;  %v126_v40 = vadd.f32 %v118_v27, %v515_v4  ;;  %v132_v42 = vrot.slane %v112_v23, 4  ;;  %p457_p3 = scmp.lt.s32.totalorder %s455_s4, %s451_s30 }
  0x2e   :  { %v127_v41 = vadd.f32 %v119_v33, %v517_v5  ;;  %v533_v43 = vadd.f32 %v129_v28, %v513_v2  ;;  %v128_v44 = vadd.f32 %v120_v34, %v519_v6  ;;  %v141_v45 = vmul.f32 3600.0, %v85_v24 }
  0x2f   :  { %v142_v46 = vmul.f32 3600.0, %v86_v29  ;;  %v143_v47 = vmul.f32 3600.0, %v87_v30  ;;  %v144_v48 = vmul.f32 3600.0, %v88_v35  ;;  %v165_v49 = vrot.slane %v105_v25, 6  ;;  %p458_p4 = por %p457_p3, %p456_p2 }
  0x30   :  { %v166_v50 = vrot.slane %v106_v31, 6  ;;  %v167_v51 = vrot.slane %v107_v32, 6  ;;  %v138_v52 = vadd.f32 %v130_v38, %v515_v4  ;;  %v139_v53 = vadd.f32 %v131_v39, %v517_v5 }
  0x31   :  { %v149_v54 = vrot.slane %v141_v45, 4  ;;  %v168_v55 = vrot.slane %v108_v36, 6  ;;  %v539_v56 = vadd.f32 %v132_v42, %v519_v6  ;;  %v173_v57 = vsub.f32 %v125_v37, %v165_v49  ;;  %p459_p5 = pnand %p458_p4, %p452_p1 }
  0x32   :  { %v174_v58 = vsub.f32 %v126_v40, %v166_v50  ;;  %v175_v59 = vsub.f32 %v127_v41, %v167_v51  ;;  %v150_v60 = vrot.slane %v142_v46, 4  ;;  %v151_v61 = vrot.slane %v143_v47, 4 }
  0x33   :  { %v152_v62 = vrot.slane %v144_v48, 4  ;;  %v176_v63 = vsub.f32 %v128_v44, %v168_v55  ;;  %v157_v0 = vadd.f32 %v149_v54, %v513_v2  ;;  %v177_v1 = vrot.slane %v105_v25, 4 }
  0x34   :  { %v178_v3 = vrot.slane %v106_v31, 4  ;;  %v179_v7 = vrot.slane %v107_v32, 4  ;;  %v180_v8 = vrot.slane %v108_v36, 4  ;;  %v209_v9 = vrot.slane %v173_v57, 7 }
  0x35   :  { %v210_v10 = vrot.slane %v174_v58, 7  ;;  %v211_v11 = vrot.slane %v175_v59, 7  ;;  %v185_v12 = vsub.f32 %v125_v37, %v177_v1  ;;  %v212_v15 = vrot.slane %v176_v63, 7 }
  0x36   :  { %v186_v13 = vsub.f32 %v126_v40, %v178_v3  ;;  %v187_v14 = vsub.f32 %v127_v41, %v179_v7  ;;  %v188_v16 = vsub.f32 %v128_v44, %v180_v8  ;;  %v241_v17 = vrot.slane %v533_v43, 6 }
  0x37   :  { %v242_v18 = vrot.slane %v138_v52, 6  ;;  %v243_v19 = vrot.slane %v139_v53, 6  ;;  %v193_v20 = vrot.slane %v185_v12, 3  ;;  %v217_v2 = vmul.f32 %v209_v9, %v185_v12 }
  0x38   :  { %v194_v21 = vrot.slane %v186_v13, 3  ;;  %v195_v22 = vrot.slane %v187_v14, 3  ;;  %v196_v23 = vrot.slane %v188_v16, 3  ;;  %v218_v24 = vmul.f32 %v210_v10, %v186_v13 }
  0x39   :  { %v219_v25 = vmul.f32 %v211_v11, %v187_v14  ;;  %v220_v26 = vmul.f32 %v212_v15, %v188_v16  ;;  %v158_v27 = vadd.f32 %v150_v60, %v515_v4  ;;  %v159_v28 = vadd.f32 %v151_v61, %v517_v5 }
  0x3a   :  { %v201_v29 = vmul.f32 %v193_v20, %v173_v57  ;;  %v225_v30 = vrot.slane %v217_v2, 2  ;;  %v160_v31 = vadd.f32 %v152_v62, %v519_v6  ;;  %v202_v32 = vmul.f32 %v194_v21, %v174_v58 }
  0x3b   :  { %v203_v33 = vmul.f32 %v195_v22, %v175_v59  ;;  %v204_v34 = vmul.f32 %v196_v23, %v176_v63  ;;  %v226_v35 = vrot.slane %v218_v24, 2  ;;  %v244_v36 = vrot.slane %v539_v56, 6 }
  0x3c   :  { %v249_v37 = vsub.f32 %v533_v43, %v241_v17  ;;  %v250_v38 = vsub.f32 %v138_v52, %v242_v18  ;;  %v227_v39 = vrot.slane %v219_v25, 2  ;;  %v228_v40 = vrot.slane %v220_v26, 2 }
  0x3d   :  { %v233_v41 = vsub.f32 %v201_v29, %v225_v30  ;;  %v251_v42 = vsub.f32 %v139_v53, %v243_v19  ;;  %v252_v4 = vsub.f32 %v539_v56, %v244_v36  ;;  %v253_v5 = vrot.slane %v533_v43, 4 }
  0x3e   :  { %v254_v44 = vrot.slane %v138_v52, 4  ;;  %v255_v45 = vrot.slane %v139_v53, 4  ;;  %v256_v6 = vrot.slane %v539_v56, 4  ;;  %v285_v46 = vrot.slane %v249_v37, 7 }
  0x3f   :  { %v286_v47 = vrot.slane %v250_v38, 7  ;;  %v287_v48 = vrot.slane %v251_v42, 7  ;;  %v261_v49 = vsub.f32 %v157_v0, %v253_v5  ;;  %v288_v54 = vrot.slane %v252_v4, 7 }
  0x40   :  { %v262_v50 = vsub.f32 %v158_v27, %v254_v44  ;;  %v263_v51 = vsub.f32 %v159_v28, %v255_v45  ;;  %v234_v55 = vsub.f32 %v202_v32, %v226_v35  ;;  %v235_v57 = vsub.f32 %v203_v33, %v227_v39 }
  0x41   :  { %v236_v58 = vsub.f32 %v204_v34, %v228_v40  ;;  %v264_v59 = vsub.f32 %v160_v31, %v256_v6  ;;  %v269_v60 = vrot.slane %v261_v49, 3  ;;  %v293_v63 = vmul.f32 %v285_v46, %v261_v49 }
  0x42   :  { %v270_v61 = vrot.slane %v262_v50, 3  ;;  %v271_v62 = vrot.slane %v263_v51, 3  ;;  %v294_v52 = vmul.f32 %v286_v47, %v262_v50  ;;  %v295_v53 = vmul.f32 %v287_v48, %v263_v51 }
  0x43   :  { %v272_v43 = vrot.slane %v264_v59, 3  ;;  %v296_v1 = vmul.f32 %v288_v54, %v264_v59  ;;  %v277_v56 = vmul.f32 %v269_v60, %v249_v37  ;;  %v301_v8 = vrot.slane %v293_v63, 2 }
  0x44   :  { %v278_v3 = vmul.f32 %v270_v61, %v250_v38  ;;  %v279_v7 = vmul.f32 %v271_v62, %v251_v42  ;;  %v302_v9 = vrot.slane %v294_v52, 2  ;;  %v303_v10 = vrot.slane %v295_v53, 2 }
  0x45   :  { %v280_v0 = vmul.f32 %v272_v43, %v252_v4  ;;  %v304_v11 = vrot.slane %v296_v1, 2  ;;  %v309_v12 = vsub.f32 %v277_v56, %v301_v8  ;;  %v482_v34 = vmov 0.0  }
  0x46   :  { %v310_v13 = vsub.f32 %v278_v3, %v302_v9  ;;  %v311_v14 = vsub.f32 %v279_v7, %v303_v10  ;;  %57 = vst.msk [vmem:[#allocation2] sm:$0x1] %vm56_vm1, %v482_v34  ;;  %58 = vst.msk [vmem:[#allocation3] sm:$0x1] %vm56_vm1, %v482_v34 }
  0x47   :  { %v312_v15 = vsub.f32 %v280_v0, %v304_v11  ;;  %v313_v16 = vsub.f32 %v233_v41, %v309_v12 }
  0x48   :  { %v314_v17 = vsub.f32 %v234_v55, %v310_v13  ;;  %v315_v18 = vsub.f32 %v235_v57, %v311_v14 }
  0x49   :  { %v316_v19 = vsub.f32 %v236_v58, %v312_v15  ;;  %v318_v20 = vmul.f32 %v313_v16, %v313_v16 }
  0x4a   :  { %v319_v21 = vmul.f32 %v314_v17, %v314_v17  ;;  %v320_v22 = vmul.f32 %v315_v18, %v315_v18 }
  0x4b   :  { %v321_v2 = vmul.f32 %v316_v19, %v316_v19  ;;  %v326_v23 = vrot.slane %v318_v20, 2 }
  0x4c   :  { %v327_v24 = vrot.slane %v319_v21, 2  ;;  %v328_v25 = vrot.slane %v320_v22, 2 }
  0x4d   :  { %v329_v26 = vrot.slane %v321_v2, 2  ;;  %v335_v27 = vsel %vm334_vm0, %v326_v23, 0.0  ;;  %v62_v47 = vld [vmem:[#allocation2] sm:$0x1]  ;;  %v317_v50 = vld [vmem:[#allocation3] sm:$0x1] }
  0x4e   :  { %v336_v28 = vsel %vm334_vm0, %v327_v24, 0.0  ;;  %v338_v29 = vsel %vm334_vm0, %v328_v25, 0.0 }
  0x4f   :  { %v337_v30 = vadd.f32 %v336_v28, %v335_v27  ;;  %v340_v31 = vsel %vm334_vm0, %v329_v26, 0.0 }
  0x51   :  { %v339_v32 = vadd.f32 %v338_v29, %v337_v30 }
  0x53   :  { %v341_v33 = vadd.f32 %v340_v31, %v339_v32 }
  0x55   :  { %342 = vadd.xlane.f32.xlu0 %v341_v33 }
  0xb3   :  { %v65_v35 = vpop.xlane.xlu0 %64 }
  0xb4   :  { %v66_v36 = vrot.slane %v65_v35, 4 }
  0xb6   :  { %v67_v37 = vadd.f32 %v66_v36, %v65_v35 }
  0xb8   :  { %v68_v38 = vrot.slane %v67_v37, 2 }
  0xba   :  { %v69_v39 = vadd.f32 %v68_v38, %v67_v37 }
  0xbc   :  { %v70_v40 = vrot.slane %v69_v39, 1 }
  0xbe   :  { %v71_v41 = vadd.f32 %v70_v40, %v69_v39 }
  0xc0   :  { %380 = vpush %v71_v41 }
  0xde   :  { %v343_v42 = vpop.xlane.xlu0 %342 }
  0xdf   :  { %v344_v4 = vrot.slane %v343_v42, 4 }
  0xe1   :  { %v345_v5 = vadd.f32 %v344_v4, %v343_v42 }
  0xe3   :  { %v346_v44 = vrot.slane %v345_v5, 2 }
  0xe5   :  { %v347_v45 = vadd.f32 %v346_v44, %v345_v5 }
  0xe7   :  { %v348_v6 = vrot.slane %v347_v45, 1 }
  0xe9   :  { %v349_v46 = vadd.f32 %v348_v6, %v347_v45 }
  0xeb   :  { %382 = vpush %v349_v46 }
  0xf1   :  { %s381_s0 = spop %380 }
  0xf2   :  { %v73_v48 = vstv %s381_s0 }
  0xf3   :  { %v74_v49 = vadd.f32 %v73_v48, %v62_v47 }
  0xf5   :  { %76 = vst.msk [vmem:[#allocation2] sm:$0x1] %vm56_vm1, %v74_v49 }
  0xfc   :  { %v357_v55 = vld [vmem:[#allocation2] sm:$0x1] }
  0xfd   :  { %v358_v59 = vmul.f32 0.001953125, %v357_v55 }
 0x11c   :  { %s383_s2 = spop %382 }
 0x11d   :  { %v351_v51 = vstv %s383_s2 }
 0x11e   :  { %v352_v54 = vadd.f32 %v351_v51, %v317_v50 }
 0x120   :  { %353 = vst.msk [vmem:[#allocation3] sm:$0x1] %vm56_vm1, %v352_v54 }
 0x127   :  { %v359_v57 = vld [vmem:[#allocation3] sm:$0x1] }
 0x128   :  { %v360_v58 = vmul.f32 0.0022222223, %v359_v57 }
 0x12a   :  { %v361_v60 = vmul.f32 1e-15, %v360_v58 }
 0x12c   :  { %v362_v61 = vadd.f32 %v361_v60, %v358_v59 }
 0x12e   :  { %363 = vst.msk [vmem:[#allocation10] sm:$0x1] %vm56_vm1, %v362_v61 }
 0x12f   :  { %462 = shalt.err (!%p459_p5)
}
 0x130   :  { %373 = dma.vmem_to_hbm [thread:$0]  %s371_s29, 16, %s562_s3, [#allocation6]  }
 0x131   :  { %475 = dma.done.wait [#allocation6], 16  }
 0x132   :  { %476 = vsyncadd [#allocation6], 4294967280 }
 0x133   :  { %377 = vsyncpa [#allocation5], 1 }
 0x134   :  { %378 = vsyncpa [#allocation8], 1 }
 0x135   :  { %379 = vsyncpa [#allocation6], 1 }

</bundles_post_ra>
